<compile_context>
chip_gen: v7x
topology: tpu7x:2x2x1
jax: 0.10.0
libtpu: 0.0.40
codegen_flags: <defaults>
</compile_context>

<pallas_src>
import functools

import jax
import jax.numpy as jnp
from jax.experimental import pallas as pl
from jax.experimental.pallas import tpu as pltpu


def _skipconv_kernel(x_ref, w_ref, b_ref, o_ref, *, nb):
    # x_ref: (nb, C_in, t_hw)   activation block, lanes = spatial
    # w_ref: (C_out, C_in)      1x1-conv weight with BN scale folded in
    # b_ref: (C_out, 1)         folded BN bias (f32)
    # o_ref: (nb, C_out, t_hw)
    # Compute is nowhere near a bottleneck here (HBM-bound); keep it simple.
    # NOTE: for strict fp32 parity with PyTorch one could pass
    # precision=jax.lax.Precision.HIGHEST; default precision matches the JAX reference.
    w = w_ref[...]
    b = b_ref[...]
    for i in range(nb):  # nb is a small, static constant
        y = jax.lax.dot_general(
            w, x_ref[i],
            dimension_numbers=(((1,), (0,)), ((), ())),
            preferred_element_type=jnp.float32,
        )
        o_ref[i] = jnp.maximum(y + b, 0.0).astype(o_ref.dtype)


def _vmem_params():
    """(double-buffered x+out tile budget, vmem_limit_bytes), generation-aware."""
    try:
        cap = int(pltpu.get_tpu_info().vmem_capacity_bytes)
    except Exception:
        cap = 64 * 1024 * 1024  # be conservative if the query is unavailable
    if cap >= 128 * 1024 * 1024:            # v5e / v6e: 128 MiB physical VMEM
        return 64 * 1024 * 1024, 98 * 1024 * 1024
    return 32 * 1024 * 1024, 48 * 1024 * 1024   # v7x: 64 MiB per TensorCore


def _largest_divisor_leq(n, cap):
    cap = min(n, max(1, cap))
    for d in range(cap, 0, -1):
        if n % d == 0:
            return d
    return 1


def _choose_tiles(N, C_in, C_out, HW, itemsize, tile_budget):
    """Pick (images-per-step nb, spatial tile t_hw) and grid extents."""
    per_buf = max(tile_budget // 2, 1)           # tile budget covers double buffering
    bytes_per_lane = (C_in + C_out) * itemsize   # x + out bytes per spatial element
    bytes_per_image = bytes_per_lane * HW

    if bytes_per_image <= per_buf:
        # Small-spatial regime: take the full spatial extent and batch images per step.
        t_hw = HW
        nb = _largest_divisor_leq(N, per_buf // bytes_per_image)
    else:
        # Large-spatial regime: one image per step, lane-dense spatial tiling.
        nb = 1
        t_hw = (per_buf // bytes_per_lane) // 128 * 128
        # TODO(synk): for extremely wide layers (where even 128 lanes exceed the budget),
        # tile C_in with an extra "arbitrary" grid axis + f32 VMEM accumulator.
        t_hw = max(t_hw, 128)
        if t_hw >= HW:
            t_hw = HW

    num_hw = pl.cdiv(HW, t_hw)
    num_nb = pl.cdiv(N, nb)

    # Avoid a degenerate 1x1 grid so v7x's two TensorCores both get a parallel shard.
    if num_hw == 1 and num_nb == 1:
        if N >= 2:
            nb = _largest_divisor_leq(N, max(1, N // 2))
            num_nb = pl.cdiv(N, nb)
        elif HW >= 256:
            t_half = (HW // 2) // 128 * 128
            if t_half >= 128:
                t_hw = t_half
                num_hw = pl.cdiv(HW, t_hw)

    return nb, t_hw, num_hw, num_nb


@jax.jit
def skip_conv(x_nchw, weight, gamma, beta, running_mean, running_var, eps=1e-5):
    """SkipConv forward: Conv2d(1x1, bias=False) -> BatchNorm2d(eval) -> ReLU.

    x_nchw:  (N, C_in, H, W)
    weight:  (C_out, C_in)  -- the (C_out, C_in, 1, 1) conv weight squeezed
    gamma, beta, running_mean, running_var: (C_out,)
    returns: (N, C_out, H, W)
    """
    N, C_in, H, W = x_nchw.shape
    C_out = weight.shape[0]
    HW = H * W

    # Fold BatchNorm (eval): y = scale*(W x) + bias == (scale*W) x + bias.
    inv_std = jax.lax.rsqrt(running_var.astype(jnp.float32) + eps)
    scale = gamma.astype(jnp.float32) * inv_std                       # (C_out,)
    w_folded = (weight.astype(jnp.float32) * scale[:, None]).astype(x_nchw.dtype)
    bias = (beta.astype(jnp.float32)
            - running_mean.astype(jnp.float32) * scale).reshape(C_out, 1)

    # Flatten spatial only (metadata reshape, no HBM pass); lanes = H*W.
    x3 = x_nchw.reshape(N, C_in, HW)

    itemsize = jnp.dtype(x_nchw.dtype).itemsize
    tile_budget, vmem_limit = _vmem_params()
    nb, t_hw, num_hw, num_nb = _choose_tiles(N, C_in, C_out, HW, itemsize, tile_budget)

    kernel = functools.partial(_skipconv_kernel, nb=nb)

    out3 = pl.pallas_call(
        kernel,
        out_shape=jax.ShapeDtypeStruct((N, C_out, HW), x_nchw.dtype),
        grid_spec=pltpu.PrefetchScalarGridSpec(
            num_scalar_prefetch=0,
            grid=(num_hw, num_nb),   # larger (spatial) parallel extent first
            in_specs=[
                pl.BlockSpec((nb, C_in, t_hw), lambda s, n: (n, 0, s)),
                pl.BlockSpec((C_out, C_in), lambda s, n: (0, 0)),
                pl.BlockSpec((C_out, 1), lambda s, n: (0, 0)),
            ],
            out_specs=pl.BlockSpec((nb, C_out, t_hw), lambda s, n: (n, 0, s)),
        ),
        compiler_params=pltpu.CompilerParams(
            dimension_semantics=("parallel", "parallel"),
            vmem_limit_bytes=int(vmem_limit)),
    )(x3, w_folded, bias)

    return out3.reshape(N, C_out, H, W)


def _reference(x_nchw, weight, gamma, beta, running_mean, running_var, eps=1e-5):
    # Pure-JAX reference of Conv2d(1x1, no bias) + BatchNorm2d(eval) + ReLU.
    y = jnp.einsum("nchw,oc->nohw", x_nchw, weight)
    inv_std = jax.lax.rsqrt(running_var + eps)
    scale = (gamma * inv_std)[None, :, None, None]
    bias = (beta - running_mean * gamma * inv_std)[None, :, None, None]
    return jnp.maximum(y * scale + bias, 0.0)


if __name__ == "__main__":
    # Small shapes consistent with the module: N=2, in_ch=4, out_ch=8, H=W=16.
    N, C_in, C_out, H, W = 2, 4, 8, 16, 16

    key = jax.random.PRNGKey(0)
    kx, kw, kg, kb, km, kv = jax.random.split(key, 6)

    x = jax.random.normal(kx, (N, C_in, H, W), dtype=jnp.float32)
    weight = jax.random.normal(kw, (C_out, C_in), dtype=jnp.float32) * 0.1
    gamma = jax.random.uniform(kg, (C_out,), minval=0.5, maxval=1.5)
    beta = jax.random.normal(kb, (C_out,)) * 0.1
    running_mean = jax.random.normal(km, (C_out,)) * 0.1
    running_var = jax.random.uniform(kv, (C_out,), minval=0.5, maxval=1.5)

    out = skip_conv(x, weight, gamma, beta, running_mean, running_var)
    out = jax.block_until_ready(out)

    ref = _reference(x, weight, gamma, beta, running_mean, running_var)
    assert out.shape == (N, C_out, H, W)
    assert jnp.allclose(out, ref, atol=1e-5, rtol=1e-5)

    print("KERNEL_OK")
</pallas_src>

<mosaic_0001>
module attributes {stable_mosaic.version = 11 : i64} {
  func.func @_skipconv_kernel(%arg0: i32, %arg1: i32, %arg2: memref<1x4x256xf32, #tpu.memory_space<vmem>>, %arg3: memref<8x4xf32, #tpu.memory_space<vmem>>, %arg4: memref<8x1xf32, #tpu.memory_space<vmem>>, %arg5: memref<1x8x256xf32, #tpu.memory_space<vmem>>) attributes {dimension_semantics = [#tpu.dimension_semantics<parallel>, #tpu.dimension_semantics<parallel>], iteration_bounds = array<i64: 1, 2>, scalar_prefetch = 0 : i64, scratch_operands = 0 : i64, tpu.core_type = #tpu.core_type<tc>, window_params = [{transform_indices = @transform_0, window_bounds = array<i64: 1, 4, 256>}, {pipeline_mode = #tpu.pipeline_mode<synchronous>, transform_indices = @transform_1, window_bounds = array<i64: 8, 4>}, {pipeline_mode = #tpu.pipeline_mode<synchronous>, transform_indices = @transform_2, window_bounds = array<i64: 8, 1>}, {transform_indices = @transform_3, window_bounds = array<i64: 1, 8, 256>}]} {
    %c0 = arith.constant 0 : index
    %c0_0 = arith.constant 0 : index
    %0 = vector.load %arg3[%c0, %c0_0] : memref<8x4xf32, #tpu.memory_space<vmem>>, vector<8x4xf32>
    %c0_1 = arith.constant 0 : index
    %c0_2 = arith.constant 0 : index
    %1 = vector.load %arg4[%c0_1, %c0_2] : memref<8x1xf32, #tpu.memory_space<vmem>>, vector<8x1xf32>
    %c0_3 = arith.constant 0 : index
    %c0_4 = arith.constant 0 : index
    %c0_5 = arith.constant 0 : index
    %2 = vector.load %arg2[%c0_3, %c0_4, %c0_5] : memref<1x4x256xf32, #tpu.memory_space<vmem>>, vector<1x4x256xf32>
    %3 = vector.shape_cast %2 : vector<1x4x256xf32> to vector<4x256xf32>
    %cst = arith.constant dense<0.000000e+00> : vector<8x256xf32>
    %4 = tpu.matmul %0, %3, %cst {dimension_numbers = #tpu.dot_dimension_numbers<[1], [0], [0], [1], [0, 0, 1, 1], [], []>} : vector<8x4xf32>, vector<4x256xf32>, vector<8x256xf32> -> vector<8x256xf32>
    %5 = vector.broadcast %1 : vector<8x1xf32> to vector<8x256xf32>
    %6 = arith.addf %4, %5 : vector<8x256xf32>
    %cst_6 = arith.constant 0.000000e+00 : f32
    %7 = vector.broadcast %cst_6 : f32 to vector<8x256xf32>
    %8 = arith.maximumf %6, %7 : vector<8x256xf32>
    %c0_7 = arith.constant 0 : index
    %c0_8 = arith.constant 0 : index
    %c0_9 = arith.constant 0 : index
    %9 = vector.load %arg5[%c0_7, %c0_8, %c0_9] : memref<1x8x256xf32, #tpu.memory_space<vmem>>, vector<1x8x256xf32>
    %10 = vector.shape_cast %9 : vector<1x8x256xf32> to vector<8x256xf32>
    %11 = vector.shape_cast %8 : vector<8x256xf32> to vector<1x8x256xf32>
    tpu.vector_store %arg5[%c0_7, %c0_8, %c0_9], %11 {strides = array<i32>} : memref<1x8x256xf32, #tpu.memory_space<vmem>>, vector<1x8x256xf32>,
    return
  }
  func.func @transform_0(%arg0: i32, %arg1: i32) -> (i32, i32, i32) {
    %c0_i32 = arith.constant 0 : i32
    %c0_i32_0 = arith.constant 0 : i32
    return %arg1, %c0_i32, %arg0 : i32, i32, i32
  }
  func.func @transform_1(%arg0: i32, %arg1: i32) -> (i32, i32) {
    %c0_i32 = arith.constant 0 : i32
    %c0_i32_0 = arith.constant 0 : i32
    %c0_i32_1 = arith.constant 0 : i32
    return %c0_i32, %c0_i32_0 : i32, i32
  }
  func.func @transform_2(%arg0: i32, %arg1: i32) -> (i32, i32) {
    %c0_i32 = arith.constant 0 : i32
    %c0_i32_0 = arith.constant 0 : i32
    %c0_i32_1 = arith.constant 0 : i32
    return %c0_i32, %c0_i32_0 : i32, i32
  }
  func.func @transform_3(%arg0: i32, %arg1: i32) -> (i32, i32, i32) {
    %c0_i32 = arith.constant 0 : i32
    %c0_i32_0 = arith.constant 0 : i32
    return %arg1, %c0_i32, %arg0 : i32, i32, i32
  }
}

</mosaic_0001>

<bundles_post_ra>
// kernel: skip_conv.1
= control target key start
LH: loop header
LB: loop body
LE: loop exit
PB: predicated region body
PF: predicated region fallthrough
CT: control target
= control target key end

     0   :  { %s481_s12 = smov 0   ;;  %s483_s13 = smov 0   ;;  %s520_s0 = inlined_call_operand.vmem [shape: f32[2,4,256], index: 0, kind: input, shape index: {}]   ;;  %s521_s1 = inlined_call_operand.vmem [shape: f32[8,4], index: 1, kind: input, shape index: {}]   ;;  %s522_s2 = inlined_call_operand.vmem [shape: f32[8,1], index: 2, kind: input, shape index: {}]   ;;  %s523_s3 = inlined_call_operand.vmem [shape: f32[2,8,256], index: 3, kind: output, shape index: {}]  }
   0x1   :  { %s485_s14 = smov 0  }
   0x2 LB: > { %s22_s15 = sadd.s32 1, %s453_s13  ;;  %p395_p0 = scmp.ge.s32.totalorder %s457_s14, 1  ;;  %s457_s14 = sphi %s485_s14, %s13_s14   ;;  %s453_s13 = sphi %s483_s13, %s525_s13   ;;  %s449_s12 = sphi %s481_s12, %s524_s12  }
   0x3   : > { %p23_p1 = scmp.ge.s32.totalorder %s22_s15, 2  ;;  %p158_p2 = scmp.lt.s32.totalorder %s457_s14, 3 }
   0x5   : > { %s527_s15 = smov (%p23_p1, %s22_s15), 0  ;;  %p159_p3 = pnand %p395_p0, %p158_p2 }
   0x6   : > { %p191_p4 = scmp.lt.s32.totalorder (!%p159_p3), %s449_s12, 1  ;;  %v459_v0 = vmov (!%p159_p3), 0.0   ;;  %v460_v1 = vmov (!%p159_p3), 0   ;;  %v211_v2 = vld [vmem:[%s522_s2] sm:$0xff] (!%p159_p3)  ;;  %vm224_vm0 = vcmask (!%p159_p3), 1043456   ;;  %vm220_vm1 = vcmask (!%p159_p3), 31744  }
   0x7   : > { %162 = sbr.rel (%p159_p3) target bundleno = 240 (0xf0), region = 32  ;;  %293 = vmatprep.mubr.f32.mxu0 (!%p159_p3), %v459_v0  ;;  %433 = vset.pattern.permute.xlu0 (!%p159_p3), %v460_v1  ;;  %v210_v5 = vld [vmem:[%s521_s1] sm:$0xff] (!%p159_p3) }
   0x8   : > { %215 = vperm.xlu0 (!%p159_p3), %433, %v211_v2  }
   0xe   : > { %s529_s12 = smov (!%p191_p4, %s449_s12), 1 }
   0xf   : > { %s405_s18 = sshll.u32 %s529_s12, 3  ;;  %s406_s24 = sshll.u32 %s529_s12, 4 }
  0x10   : > { %s198_s21 = scalar_lea.vmem %s520_s0, %s405_s18  ;;  %s208_s27 = scalar_lea.vmem %s523_s3, %s406_s24 }
  0x11   : > { %v212_v3 = vld [vmem:[%s198_s21] sm:$0xff] }
  0x12   : > { %v219_v4 = vcombine.high %v212_v3, %v212_v3 }
  0x14   : > { %400 = vmatprep.subr.msk.mxu0 %vm224_vm0, %v219_v4 }
  0x15   : > { %401 = vmatpush1.msk.msra.mxu0 %vm224_vm0, %v212_v3 }
  0x16   : > { %402 = vmatmul.mubr.msk.f32.vlgmr.msra.gmra.mrb[0].mxu0 %vm220_vm1, %v210_v5 }
  0x87   : > { %v216_v6 = vpop.permute.xlu0 %215 }
  0xe9   : > { %v295_v7 = vpop.f32.mrb[0].mxu0 }
  0xea   : > { %v296_v8 = vadd.f32 %v295_v7, %v216_v6  ;;  %v297_v9 = vpop.f32.mrb[1].mxu0 }
  0xeb   : > { %v298_v10 = vadd.f32 %v297_v9, %v216_v6 }
  0xec   : > { %v300_v11 = vmax.f32 %v296_v8, 0.0 }
  0xed   : > { %v301_v12 = vmax.f32 %v298_v10, 0.0 }
  0xee   : > { %302 = vst [vmem:[%s208_s27] sm:$0xff] %v300_v11 }
  0xef   : > { %303 = vst [vmem:[%s208_s27 + $0x8] sm:$0xff] %v301_v12 }
  0xf0 PF: > { %s13_s14 = sadd.s32 1, %s457_s14   ;;  %s524_s12 = smov %s453_s13 }
  0xf1   : > { %p10_p5 = scmp.ge.s32.totalorder %s13_s14, 4   ;;  %s525_s13 = smov %s527_s15 }
  0xf3   :  { %12 = sbr.rel (!%p10_p5) target bundleno = 2 (0x2), region = 62 }

</bundles_post_ra>
